<compile_context>
chip_gen: v6e
topology: v6e:2x2x1
jax: 0.10.0
libtpu: 0.0.40
codegen_flags: <defaults>
</compile_context>

<pallas_src>
import jax
import jax.numpy as jnp
from jax.experimental import pallas as pl
from jax.experimental.pallas import tpu as pltpu


def critic_kernel(x_ref, w1_ref, b1_ref, w2_ref, b2_ref, w3_ref, b3_ref, o_ref):
    """One batch tile of the 3-layer critic MLP.

    x_ref : (input_dim, TILE_B) bf16   -- batch in the lane axis
    w1    : (fc1, input_dim)    bf16   -- PyTorch (out, in) orientation
    w2    : (fc2, fc1)          bf16
    w3    : (fc2, 1)            f32    -- used on the VPU, kept f32
    b1,b2 : (fc*, 1)            f32
    b3    : (1, 1)              f32
    o_ref : (1, TILE_B)         f32    -- lane-dense value row
    """
    x = x_ref[...]

    # Layer 1: (fc1, in) @ (in, TILE_B) on the MXU, f32 accumulate + f32 epilogue.
    h1 = jnp.dot(w1_ref[...], x, preferred_element_type=jnp.float32)
    h1 = jnp.maximum(h1 + b1_ref[...], 0.0)

    # Layer 2: (fc2, fc1) @ (fc1, TILE_B).
    h2 = jnp.dot(w2_ref[...], h1.astype(jnp.bfloat16),
                 preferred_element_type=jnp.float32)
    h2 = jnp.maximum(h2 + b2_ref[...], 0.0)

    # Layer 3 (fc2 -> 1): VPU multiply + sublane reduction (skips an N=1 matmul),
    # result is already lane-dense (1, TILE_B).
    v = jnp.sum(h2 * w3_ref[...], axis=0, keepdims=True) + b3_ref[...]
    o_ref[...] = v.astype(o_ref.dtype)


def critic_forward(state, params, *, tile_b=256):
    """state: (B, input_dim) float32. params in PyTorch layout (w: (out,in), b: (out,)).
    Returns value: (B, 1) float32."""
    w1, b1, w2, b2, w3, b3 = params
    B, input_dim = state.shape
    fc1 = w1.shape[0]
    fc2 = w2.shape[0]

    # Batch tile: multiple of 128 lanes, no bigger than needed for small batches.
    tile_b = max(128, (tile_b // 128) * 128)
    tile_b = min(tile_b, pl.cdiv(B, 128) * 128)
    b_pad = pl.cdiv(B, tile_b) * tile_b
    grid = (b_pad // tile_b,)

    # Kernel-layout operands: batch in lanes, bf16 MXU operands, f32 epilogue terms.
    x_t = jnp.pad(state, ((0, b_pad - B), (0, 0))).T.astype(jnp.bfloat16)
    w1_k = w1.astype(jnp.bfloat16)                  # (fc1, input_dim)
    w2_k = w2.astype(jnp.bfloat16)                  # (fc2, fc1)
    w3_k = w3.reshape(fc2, 1).astype(jnp.float32)   # (fc2, 1) column for VPU path
    b1_k = b1.reshape(fc1, 1).astype(jnp.float32)
    b2_k = b2.reshape(fc2, 1).astype(jnp.float32)
    b3_k = b3.reshape(1, 1).astype(jnp.float32)

    resident = lambda i: (0, 0)                     # weights stay put across grid steps
    flops = 2 * b_pad * (input_dim * fc1 + fc1 * fc2 + fc2)
    bytes_accessed = (x_t.size * 2 + w1_k.size * 2 + w2_k.size * 2
                      + (w3_k.size + b1_k.size + b2_k.size + b3_k.size) * 4
                      + b_pad * 4)

    out = pl.pallas_call(
        critic_kernel,
        out_shape=jax.ShapeDtypeStruct((1, b_pad), jnp.float32),
        grid=grid,
        in_specs=[
            pl.BlockSpec((input_dim, tile_b), lambda i: (0, i)),  # state^T tile
            pl.BlockSpec((fc1, input_dim), resident),             # w1
            pl.BlockSpec((fc1, 1), resident),                     # b1
            pl.BlockSpec((fc2, fc1), resident),                   # w2
            pl.BlockSpec((fc2, 1), resident),                     # b2
            pl.BlockSpec((fc2, 1), resident),                     # w3
            pl.BlockSpec((1, 1), resident),                       # b3
        ],
        out_specs=pl.BlockSpec((1, tile_b), lambda i: (0, i)),
        compiler_params=pltpu.CompilerParams(
            dimension_semantics=("parallel",)),
        cost_estimate=pl.CostEstimate(
            flops=flops, transcendentals=0, bytes_accessed=bytes_accessed),
    )(x_t, w1_k, b1_k, w2_k, b2_k, w3_k, b3_k)

    return out[0, :B].reshape(B, 1)


def init_params(key, input_dim, fc1_dims=256, fc2_dims=256):
    """PyTorch-layout params: w (out, in), b (out,), init U(-1/sqrt(fan_in), +)."""
    def linear(key, fan_in, fan_out):
        kw, kb = jax.random.split(key)
        bound = 1.0 / jnp.sqrt(jnp.float32(fan_in))
        w = jax.random.uniform(kw, (fan_out, fan_in), jnp.float32, -bound, bound)
        b = jax.random.uniform(kb, (fan_out,), jnp.float32, -bound, bound)
        return w, b

    k1, k2, k3 = jax.random.split(key, 3)
    w1, b1 = linear(k1, input_dim, fc1_dims)
    w2, b2 = linear(k2, fc1_dims, fc2_dims)
    w3, b3 = linear(k3, fc2_dims, 1)
    return (w1, b1, w2, b2, w3, b3)


def critic_ref(state, params, matmul_dtype=jnp.float32):
    """Pure-JAX reference (optionally with the same bf16 operand casting)."""
    w1, b1, w2, b2, w3, b3 = params
    x = state.astype(matmul_dtype)
    h1 = jnp.dot(x, w1.T.astype(matmul_dtype),
                 preferred_element_type=jnp.float32) + b1
    h1 = jnp.maximum(h1, 0.0)
    h2 = jnp.dot(h1.astype(matmul_dtype), w2.T.astype(matmul_dtype),
                 preferred_element_type=jnp.float32) + b2
    h2 = jnp.maximum(h2, 0.0)
    return jnp.dot(h2, w3.T.astype(jnp.float32)) + b3


if __name__ == "__main__":
    key = jax.random.PRNGKey(0)
    k_params, k_state = jax.random.split(key)

    batch = 8
    input_dim = 8          # env observation size (input_dims of the PyTorch module)
    params = init_params(k_params, input_dim, fc1_dims=256, fc2_dims=256)
    state = jax.random.normal(k_state, (batch, input_dim), jnp.float32)

    value = jax.block_until_ready(critic_forward(state, params))

    assert value.shape == (batch, 1)
    # Tight check vs a reference using the same bf16 operand casting.
    expected_bf16 = critic_ref(state, params, matmul_dtype=jnp.bfloat16)
    assert jnp.allclose(value, expected_bf16, atol=2e-3, rtol=2e-3)
    # Loose check vs the full-f32 reference (bf16 operand quantization error).
    expected_f32 = critic_ref(state, params, matmul_dtype=jnp.float32)
    assert jnp.allclose(value, expected_f32, atol=5e-2, rtol=5e-2)

    print("KERNEL_OK")
</pallas_src>

<mosaic_0001>
module attributes {stable_mosaic.version = 11 : i64} {
  func.func @critic_kernel(%arg0: i32, %arg1: memref<8x128xbf16, #tpu.memory_space<vmem>>, %arg2: memref<256x8xbf16, #tpu.memory_space<vmem>>, %arg3: memref<256x1xf32, #tpu.memory_space<vmem>>, %arg4: memref<256x256xbf16, #tpu.memory_space<vmem>>, %arg5: memref<256x1xf32, #tpu.memory_space<vmem>>, %arg6: memref<256x1xf32, #tpu.memory_space<vmem>>, %arg7: memref<1x1xf32, #tpu.memory_space<vmem>>, %arg8: memref<1x128xf32, #tpu.memory_space<vmem>>) attributes {dimension_semantics = [#tpu.dimension_semantics<parallel>], iteration_bounds = array<i64: 1>, scalar_prefetch = 0 : i64, scratch_operands = 0 : i64, tpu.core_type = #tpu.core_type<tc>, window_params = [{transform_indices = @transform_0, window_bounds = array<i64: 8, 128>}, {pipeline_mode = #tpu.pipeline_mode<synchronous>, transform_indices = @transform_1, window_bounds = array<i64: 256, 8>}, {pipeline_mode = #tpu.pipeline_mode<synchronous>, transform_indices = @transform_2, window_bounds = array<i64: 256, 1>}, {pipeline_mode = #tpu.pipeline_mode<synchronous>, transform_indices = @transform_3, window_bounds = array<i64: 256, 256>}, {pipeline_mode = #tpu.pipeline_mode<synchronous>, transform_indices = @transform_4, window_bounds = array<i64: 256, 1>}, {pipeline_mode = #tpu.pipeline_mode<synchronous>, transform_indices = @transform_5, window_bounds = array<i64: 256, 1>}, {pipeline_mode = #tpu.pipeline_mode<synchronous>, transform_indices = @transform_6, window_bounds = array<i64: 1, 1>}, {transform_indices = @transform_7, window_bounds = array<i64: 1, 128>}]} {
    %c0 = arith.constant 0 : index
    %c0_0 = arith.constant 0 : index
    %0 = vector.load %arg1[%c0, %c0_0] : memref<8x128xbf16, #tpu.memory_space<vmem>>, vector<8x128xbf16>
    %c0_1 = arith.constant 0 : index
    %c0_2 = arith.constant 0 : index
    %1 = vector.load %arg2[%c0_1, %c0_2] : memref<256x8xbf16, #tpu.memory_space<vmem>>, vector<256x8xbf16>
    %cst = arith.constant dense<0.000000e+00> : vector<256x128xf32>
    %2 = tpu.matmul %1, %0, %cst {dimension_numbers = #tpu.dot_dimension_numbers<[1], [0], [0], [1], [0, 0, 1, 1], [], []>} : vector<256x8xbf16>, vector<8x128xbf16>, vector<256x128xf32> -> vector<256x128xf32>
    %c0_3 = arith.constant 0 : index
    %c0_4 = arith.constant 0 : index
    %3 = vector.load %arg3[%c0_3, %c0_4] : memref<256x1xf32, #tpu.memory_space<vmem>>, vector<256x1xf32>
    %4 = vector.broadcast %3 : vector<256x1xf32> to vector<256x128xf32>
    %5 = arith.addf %2, %4 : vector<256x128xf32>
    %cst_5 = arith.constant 0.000000e+00 : f32
    %6 = vector.broadcast %cst_5 : f32 to vector<256x128xf32>
    %7 = arith.maximumf %5, %6 : vector<256x128xf32>
    %c0_6 = arith.constant 0 : index
    %c0_7 = arith.constant 0 : index
    %8 = vector.load %arg4[%c0_6, %c0_7] : memref<256x256xbf16, #tpu.memory_space<vmem>>, vector<256x256xbf16>
    %9 = arith.truncf %7 : vector<256x128xf32> to vector<256x128xbf16>
    %cst_8 = arith.constant dense<0.000000e+00> : vector<256x128xf32>
    %10 = tpu.matmul %8, %9, %cst_8 {dimension_numbers = #tpu.dot_dimension_numbers<[1], [0], [0], [1], [0, 0, 1, 1], [], []>} : vector<256x256xbf16>, vector<256x128xbf16>, vector<256x128xf32> -> vector<256x128xf32>
    %c0_9 = arith.constant 0 : index
    %c0_10 = arith.constant 0 : index
    %11 = vector.load %arg5[%c0_9, %c0_10] : memref<256x1xf32, #tpu.memory_space<vmem>>, vector<256x1xf32>
    %12 = vector.broadcast %11 : vector<256x1xf32> to vector<256x128xf32>
    %13 = arith.addf %10, %12 : vector<256x128xf32>
    %cst_11 = arith.constant 0.000000e+00 : f32
    %14 = vector.broadcast %cst_11 : f32 to vector<256x128xf32>
    %15 = arith.maximumf %13, %14 : vector<256x128xf32>
    %c0_12 = arith.constant 0 : index
    %c0_13 = arith.constant 0 : index
    %16 = vector.load %arg6[%c0_12, %c0_13] : memref<256x1xf32, #tpu.memory_space<vmem>>, vector<256x1xf32>
    %17 = vector.broadcast %16 : vector<256x1xf32> to vector<256x128xf32>
    %18 = arith.mulf %15, %17 : vector<256x128xf32>
    %cst_14 = arith.constant dense<0.000000e+00> : vector<128xf32>
    %19 = vector.multi_reduction <add>, %18, %cst_14 [0] : vector<256x128xf32> to vector<128xf32>
    %20 = vector.shape_cast %19 : vector<128xf32> to vector<1x128xf32>
    %c0_15 = arith.constant 0 : index
    %c0_16 = arith.constant 0 : index
    %21 = vector.load %arg7[%c0_15, %c0_16] : memref<1x1xf32, #tpu.memory_space<vmem>>, vector<1x1xf32>
    %22 = vector.broadcast %21 : vector<1x1xf32> to vector<1x128xf32>
    %23 = arith.addf %20, %22 : vector<1x128xf32>
    %c0_17 = arith.constant 0 : index
    %c0_18 = arith.constant 0 : index
    %24 = vector.load %arg8[%c0_17, %c0_18] : memref<1x128xf32, #tpu.memory_space<vmem>>, vector<1x128xf32>
    tpu.vector_store %arg8[%c0_17, %c0_18], %23 {strides = array<i32>} : memref<1x128xf32, #tpu.memory_space<vmem>>, vector<1x128xf32>,
    return
  }
  func.func @transform_0(%arg0: i32) -> (i32, i32) {
    %c0_i32 = arith.constant 0 : i32
    %c0_i32_0 = arith.constant 0 : i32
    return %c0_i32, %arg0 : i32, i32
  }
  func.func @transform_1(%arg0: i32) -> (i32, i32) {
    %c0_i32 = arith.constant 0 : i32
    %c0_i32_0 = arith.constant 0 : i32
    %c0_i32_1 = arith.constant 0 : i32
    return %c0_i32, %c0_i32_0 : i32, i32
  }
  func.func @transform_2(%arg0: i32) -> (i32, i32) {
    %c0_i32 = arith.constant 0 : i32
    %c0_i32_0 = arith.constant 0 : i32
    %c0_i32_1 = arith.constant 0 : i32
    return %c0_i32, %c0_i32_0 : i32, i32
  }
  func.func @transform_3(%arg0: i32) -> (i32, i32) {
    %c0_i32 = arith.constant 0 : i32
    %c0_i32_0 = arith.constant 0 : i32
    %c0_i32_1 = arith.constant 0 : i32
    return %c0_i32, %c0_i32_0 : i32, i32
  }
  func.func @transform_4(%arg0: i32) -> (i32, i32) {
    %c0_i32 = arith.constant 0 : i32
    %c0_i32_0 = arith.constant 0 : i32
    %c0_i32_1 = arith.constant 0 : i32
    return %c0_i32, %c0_i32_0 : i32, i32
  }
  func.func @transform_5(%arg0: i32) -> (i32, i32) {
    %c0_i32 = arith.constant 0 : i32
    %c0_i32_0 = arith.constant 0 : i32
    %c0_i32_1 = arith.constant 0 : i32
    return %c0_i32, %c0_i32_0 : i32, i32
  }
  func.func @transform_6(%arg0: i32) -> (i32, i32) {
    %c0_i32 = arith.constant 0 : i32
    %c0_i32_0 = arith.constant 0 : i32
    %c0_i32_1 = arith.constant 0 : i32
    return %c0_i32, %c0_i32_0 : i32, i32
  }
  func.func @transform_7(%arg0: i32) -> (i32, i32) {
    %c0_i32 = arith.constant 0 : i32
    %c0_i32_0 = arith.constant 0 : i32
    return %c0_i32, %arg0 : i32, i32
  }
}

</mosaic_0001>

<bundles_post_ra>
// kernel: tpu_custom_call.1
= control target key start
LH: loop header
LB: loop body
LE: loop exit
PB: predicated region body
PF: predicated region fallthrough
CT: control target
= control target key end

     0   :  { %s2580_s0 = inlined_call_operand.vmem [shape: bf16[8,128], index: 0, kind: input, shape index: {}]   ;;  %s2581_s1 = inlined_call_operand.vmem [shape: bf16[256,8], index: 1, kind: input, shape index: {}]   ;;  %s2582_s2 = inlined_call_operand.vmem [shape: f32[256,1], index: 2, kind: input, shape index: {}]   ;;  %s2583_s3 = inlined_call_operand.vmem [shape: bf16[256,256], index: 3, kind: input, shape index: {}]   ;;  %s2584_s4 = inlined_call_operand.vmem [shape: f32[256,1], index: 4, kind: input, shape index: {}]   ;;  %s2585_s5 = inlined_call_operand.vmem [shape: f32[256,1], index: 5, kind: input, shape index: {}]   ;;  %s2586_s6 = inlined_call_operand.<no memory space> [shape: f32[1,1], index: 6, kind: input, shape index: {}]   ;;  %s2587_s7 = inlined_call_operand.hbm [shape: f32[1,128], index: 7, kind: output, shape index: {}]  }
   0x1   :  { %v12_v0 = vstv %s2586_s6 }
   0x2   :  { %13 = vst [vmem:[#allocation2] sm:$0x1] %v12_v0 }
   0x3   :  { %v30_v1 = vld [vmem:[%s2580_s0] sm:$0xf]  ;;  %vm384_vm0 = vcmask 1043456   ;;  %v93_v2 = vld [vmem:[%s2582_s2 + $0xf0] sm:$0xff]  ;;  %v1795_v4 = vmov 0   ;;  %vm335_vm1 = vcmask 64512  }
   0x4   :  { %v77_v3 = vld [vmem:[%s2582_s2 + $0x70] sm:$0xff]  ;;  %1708 = vset.pattern.permute.xlu1 %v1795_v4  ;;  %1707 = vset.pattern.permute.xlu0 %v1795_v4  ;;  %v386_v5 = vsel %vm384_vm0, %v30_v1, 0  ;;  %v1709_v6 = vld [vmem:[%s2581_s1] sm:$0xff]   ;;  %v1710_v7 = vld [vmem:[%s2581_s1 + $0x8] sm:$0xff]  }
   0x5   :  { %1704 = vmatprep.subr.msk.bf16.mxu0 %vm384_vm0, %v30_v1  ;;  %247 = vperm.xlu0 %1707, %v93_v2   ;;  %v94_v8 = vld [vmem:[%s2582_s2 + $0xf8] sm:$0xff]  ;;  %v1711_v10 = vld [vmem:[%s2581_s1 + $0x10] sm:$0xff]   ;;  %v91_v11 = vld [vmem:[%s2582_s2 + $0xe0] sm:$0xff] }
   0x6   :  { %167 = vperm.xlu1 %1708, %v77_v3   ;;  %1655 = vmatpush3.bf16.msra.mxu0 %v386_v5  ;;  %v78_v9 = vld [vmem:[%s2582_s2 + $0x78] sm:$0xff]  ;;  %v92_v12 = vld [vmem:[%s2582_s2 + $0xe8] sm:$0xff]  ;;  %v75_v14 = vld [vmem:[%s2582_s2 + $0x60] sm:$0xff] }
   0x7   :  { %1656 = vmatprep.mubr.msk.bf16.mxu0 %vm335_vm1, %v1709_v6  ;;  %v1712_v13 = vld [vmem:[%s2581_s1 + $0x18] sm:$0xff]   ;;  %v1713_v15 = vld [vmem:[%s2581_s1 + $0x20] sm:$0xff]   ;;  %v76_v16 = vld [vmem:[%s2582_s2 + $0x68] sm:$0xff] }
   0x8   :  { %v89_v17 = vld [vmem:[%s2582_s2 + $0xd0] sm:$0xff]  ;;  %v90_v18 = vld [vmem:[%s2582_s2 + $0xd8] sm:$0xff]  ;;  %v1714_v19 = vld [vmem:[%s2581_s1 + $0x28] sm:$0xff]  }
   0x9   :  { %1657 = vmatmul.mubr.msk.bf16.vlgmr.msra.gmra.mxu0 %vm335_vm1, %v1710_v7  ;;  %252 = vperm.xlu0 %1707, %v94_v8   ;;  %v73_v20 = vld [vmem:[%s2582_s2 + $0x50] sm:$0xff]  ;;  %v74_v22 = vld [vmem:[%s2582_s2 + $0x58] sm:$0xff]  ;;  %v87_v23 = vld [vmem:[%s2582_s2 + $0xc0] sm:$0xff] }
   0xa   :  { %172 = vperm.xlu1 %1708, %v78_v9   ;;  %1660 = vmatprep.mubr.msk.bf16.mxu0 %vm335_vm1, %v1711_v10  ;;  %v1715_v21 = vld [vmem:[%s2581_s1 + $0x30] sm:$0xff]   ;;  %v88_v24 = vld [vmem:[%s2582_s2 + $0xc8] sm:$0xff]  ;;  %v1716_v25 = vld [vmem:[%s2581_s1 + $0x38] sm:$0xff]  }
   0xb   :  { %v71_v26 = vld [vmem:[%s2582_s2 + $0x40] sm:$0xff]  ;;  %v72_v28 = vld [vmem:[%s2582_s2 + $0x48] sm:$0xff]  ;;  %v85_v29 = vld [vmem:[%s2582_s2 + $0xb0] sm:$0xff] }
   0xc   :  { %v1717_v27 = vld [vmem:[%s2581_s1 + $0x40] sm:$0xff]   ;;  %v86_v30 = vld [vmem:[%s2582_s2 + $0xb8] sm:$0xff]  ;;  %v1718_v31 = vld [vmem:[%s2581_s1 + $0x48] sm:$0xff]  }
   0xd   :  { %237 = vperm.xlu0 %1707, %v91_v11   ;;  %v69_v32 = vld [vmem:[%s2582_s2 + $0x30] sm:$0xff]  ;;  %v70_v34 = vld [vmem:[%s2582_s2 + $0x38] sm:$0xff]  ;;  %v83_v35 = vld [vmem:[%s2582_s2 + $0xa0] sm:$0xff] }
   0xe   :  { %242 = vperm.xlu1 %1708, %v92_v12   ;;  %v1719_v33 = vld [vmem:[%s2581_s1 + $0x50] sm:$0xff]   ;;  %v84_v36 = vld [vmem:[%s2582_s2 + $0xa8] sm:$0xff]  ;;  %v1720_v37 = vld [vmem:[%s2581_s1 + $0x58] sm:$0xff]  }
   0xf   :  { %v67_v38 = vld [vmem:[%s2582_s2 + $0x20] sm:$0xff]  ;;  %v68_v40 = vld [vmem:[%s2582_s2 + $0x28] sm:$0xff]  ;;  %v82_v41 = vld [vmem:[%s2582_s2 + $0x98] sm:$0xff] }
  0x10   :  { %v1721_v39 = vld [vmem:[%s2581_s1 + $0x60] sm:$0xff]   ;;  %v81_v42 = vld [vmem:[%s2582_s2 + $0x90] sm:$0xff]  ;;  %v1722_v43 = vld [vmem:[%s2581_s1 + $0x68] sm:$0xff]  }
  0x11   :  { %1661 = vmatmul.mubr.msk.bf16.gmra.mxu0 %vm335_vm1, %v1712_v13  ;;  %157 = vperm.xlu0 %1707, %v75_v14   ;;  %v66_v44 = vld [vmem:[%s2582_s2 + $0x18] sm:$0xff]  ;;  %v65_v45 = vld [vmem:[%s2582_s2 + $0x10] sm:$0xff]  ;;  %v80_v47 = vld [vmem:[%s2582_s2 + $0x88] sm:$0xff] }
  0x12   :  { %162 = vperm.xlu1 %1708, %v76_v16   ;;  %1664 = vmatprep.mubr.msk.bf16.mxu0 %vm335_vm1, %v1713_v15  ;;  %v1723_v46 = vld [vmem:[%s2581_s1 + $0x70] sm:$0xff]   ;;  %v79_v48 = vld [vmem:[%s2582_s2 + $0x80] sm:$0xff] }
  0x15   :  { %227 = vperm.xlu0 %1707, %v89_v17  }
  0x16   :  { %232 = vperm.xlu1 %1708, %v90_v18  }
  0x19   :  { %1665 = vmatmul.mubr.msk.bf16.gmra.mxu0 %vm335_vm1, %v1714_v19  ;;  %147 = vperm.xlu0 %1707, %v73_v20  }
  0x1a   :  { %152 = vperm.xlu1 %1708, %v74_v22   ;;  %1668 = vmatprep.mubr.msk.bf16.mxu0 %vm335_vm1, %v1715_v21 }
  0x1d   :  { %217 = vperm.xlu0 %1707, %v87_v23  }
  0x1e   :  { %222 = vperm.xlu1 %1708, %v88_v24  }
  0x21   :  { %1669 = vmatmul.mubr.msk.bf16.gmra.mxu0 %vm335_vm1, %v1716_v25  ;;  %137 = vperm.xlu0 %1707, %v71_v26  }
  0x22   :  { %142 = vperm.xlu1 %1708, %v72_v28   ;;  %1672 = vmatprep.mubr.msk.bf16.mxu0 %vm335_vm1, %v1717_v27 }
  0x25   :  { %207 = vperm.xlu0 %1707, %v85_v29  }
  0x26   :  { %212 = vperm.xlu1 %1708, %v86_v30  }
  0x29   :  { %1673 = vmatmul.mubr.msk.bf16.gmra.mxu0 %vm335_vm1, %v1718_v31  ;;  %127 = vperm.xlu0 %1707, %v69_v32  }
  0x2a   :  { %132 = vperm.xlu1 %1708, %v70_v34   ;;  %1676 = vmatprep.mubr.msk.bf16.mxu0 %vm335_vm1, %v1719_v33 }
  0x2d   :  { %197 = vperm.xlu0 %1707, %v83_v35  }
  0x2e   :  { %202 = vperm.xlu1 %1708, %v84_v36  }
  0x31   :  { %1677 = vmatmul.mubr.msk.bf16.gmra.mxu0 %vm335_vm1, %v1720_v37  ;;  %117 = vperm.xlu0 %1707, %v67_v38  }
  0x32   :  { %122 = vperm.xlu1 %1708, %v68_v40   ;;  %1680 = vmatprep.mubr.msk.bf16.mxu0 %vm335_vm1, %v1721_v39 }
  0x35   :  { %187 = vperm.xlu0 %1707, %v81_v42  }
  0x36   :  { %192 = vperm.xlu1 %1708, %v82_v41  }
  0x39   :  { %1681 = vmatmul.mubr.msk.bf16.gmra.mxu0 %vm335_vm1, %v1722_v43  ;;  %107 = vperm.xlu0 %1707, %v65_v45  }
  0x3a   :  { %112 = vperm.xlu1 %1708, %v66_v44   ;;  %1684 = vmatprep.mubr.msk.bf16.mxu0 %vm335_vm1, %v1723_v46 }
  0x3b   :  { %14 = vsyncpa [#allocation4], 0  ;;  %v1724_v49 = vld [vmem:[%s2581_s1 + $0x78] sm:$0xff]   ;;  %v63_v50 = vld [vmem:[%s2582_s2] sm:$0xff] }
  0x3c   :  { %v64_v51 = vld [vmem:[%s2582_s2 + $0x8] sm:$0xff]  ;;  %v629_v52 = vld [vmem:[%s2584_s4] sm:$0xff]  ;;  %v631_v54 = vld [vmem:[%s2584_s4 + $0x10] sm:$0xff] }
  0x3d   :  { %177 = vperm.xlu0 %1707, %v79_v48   ;;  %v630_v53 = vld [vmem:[%s2584_s4 + $0x8] sm:$0xff]  ;;  %v632_v55 = vld [vmem:[%s2584_s4 + $0x18] sm:$0xff]  ;;  %v633_v56 = vld [vmem:[%s2584_s4 + $0x20] sm:$0xff] }
  0x3e   :  { %182 = vperm.xlu1 %1708, %v80_v47   ;;  %v634_v57 = vld [vmem:[%s2584_s4 + $0x28] sm:$0xff]  ;;  %v635_v58 = vld [vmem:[%s2584_s4 + $0x30] sm:$0xff]  ;;  %v636_v59 = vld [vmem:[%s2584_s4 + $0x38] sm:$0xff] }
  0x3f   :  { %v637_v60 = vld [vmem:[%s2584_s4 + $0x40] sm:$0xff]  ;;  %v638_v61 = vld [vmem:[%s2584_s4 + $0x48] sm:$0xff]  ;;  %v639_v62 = vld [vmem:[%s2584_s4 + $0x50] sm:$0xff] }
  0x40   :  { %v640_v63 = vld [vmem:[%s2584_s4 + $0x58] sm:$0xff]  ;;  %v641_v0 = vld [vmem:[%s2584_s4 + $0x60] sm:$0xff]  ;;  %v642_v1 = vld [vmem:[%s2584_s4 + $0x68] sm:$0xff] }
  0x41   :  { %1685 = vmatmul.mubr.msk.bf16.gmra.mxu0 %vm335_vm1, %v1724_v49  ;;  %97 = vperm.xlu0 %1707, %v63_v50   ;;  %v643_v2 = vld [vmem:[%s2584_s4 + $0x70] sm:$0xff]  ;;  %v644_v3 = vld [vmem:[%s2584_s4 + $0x78] sm:$0xff]  ;;  %v645_v4 = vld [vmem:[%s2584_s4 + $0x80] sm:$0xff] }
  0x42   :  { %102 = vperm.xlu1 %1708, %v64_v51   ;;  %v646_v5 = vld [vmem:[%s2584_s4 + $0x88] sm:$0xff]  ;;  %v647_v6 = vld [vmem:[%s2584_s4 + $0x90] sm:$0xff]  ;;  %v648_v7 = vld [vmem:[%s2584_s4 + $0x98] sm:$0xff] }
  0x43   :  { %v649_v8 = vld [vmem:[%s2584_s4 + $0xa0] sm:$0xff]  ;;  %v650_v9 = vld [vmem:[%s2584_s4 + $0xa8] sm:$0xff]  ;;  %v651_v10 = vld [vmem:[%s2584_s4 + $0xb0] sm:$0xff] }
  0x44   :  { %v652_v11 = vld [vmem:[%s2584_s4 + $0xb8] sm:$0xff]  ;;  %v653_v12 = vld [vmem:[%s2584_s4 + $0xc0] sm:$0xff]  ;;  %v654_v13 = vld [vmem:[%s2584_s4 + $0xc8] sm:$0xff] }
  0x45   :  { %663 = vperm.xlu0 %1707, %v629_v52   ;;  %v655_v14 = vld [vmem:[%s2584_s4 + $0xd0] sm:$0xff]  ;;  %v656_v15 = vld [vmem:[%s2584_s4 + $0xd8] sm:$0xff]  ;;  %v657_v16 = vld [vmem:[%s2584_s4 + $0xe0] sm:$0xff] }
  0x46   :  { %668 = vperm.xlu1 %1708, %v630_v53   ;;  %v658_v17 = vld [vmem:[%s2584_s4 + $0xe8] sm:$0xff]  ;;  %v1174_v18 = vld [vmem:[%s2585_s5] sm:$0xff]  ;;  %v1176_v22 = vld [vmem:[%s2585_s5 + $0x10] sm:$0xff] }
  0x47   :  { %v1175_v19 = vld [vmem:[%s2585_s5 + $0x8] sm:$0xff]  ;;  %v1177_v23 = vld [vmem:[%s2585_s5 + $0x18] sm:$0xff]  ;;  %v1178_v26 = vld [vmem:[%s2585_s5 + $0x20] sm:$0xff] }
  0x48   :  { %v1179_v27 = vld [vmem:[%s2585_s5 + $0x28] sm:$0xff]  ;;  %v1180_v30 = vld [vmem:[%s2585_s5 + $0x30] sm:$0xff]  ;;  %v1181_v31 = vld [vmem:[%s2585_s5 + $0x38] sm:$0xff] }
  0x49   :  { %673 = vperm.xlu0 %1707, %v631_v54   ;;  %v1182_v34 = vld [vmem:[%s2585_s5 + $0x40] sm:$0xff]  ;;  %v1183_v35 = vld [vmem:[%s2585_s5 + $0x48] sm:$0xff]  ;;  %v1184_v38 = vld [vmem:[%s2585_s5 + $0x50] sm:$0xff] }
  0x4a   :  { %678 = vperm.xlu1 %1708, %v632_v55   ;;  %v1185_v39 = vld [vmem:[%s2585_s5 + $0x58] sm:$0xff]  ;;  %v1186_v42 = vld [vmem:[%s2585_s5 + $0x60] sm:$0xff]  ;;  %v1187_v43 = vld [vmem:[%s2585_s5 + $0x68] sm:$0xff] }
  0x4b   :  { %v1188_v46 = vld [vmem:[%s2585_s5 + $0x70] sm:$0xff]  ;;  %v1189_v47 = vld [vmem:[%s2585_s5 + $0x78] sm:$0xff]  ;;  %v1190_v49 = vld [vmem:[%s2585_s5 + $0x80] sm:$0xff] }
  0x4c   :  { %v1191_v51 = vld [vmem:[%s2585_s5 + $0x88] sm:$0xff]  ;;  %v1192_v52 = vld [vmem:[%s2585_s5 + $0x90] sm:$0xff]  ;;  %v1193_v54 = vld [vmem:[%s2585_s5 + $0x98] sm:$0xff] }
  0x4d   :  { %683 = vperm.xlu0 %1707, %v633_v56   ;;  %v1194_v56 = vld [vmem:[%s2585_s5 + $0xa0] sm:$0xff] }
  0x4e   :  { %688 = vperm.xlu1 %1708, %v634_v57   ;;  %v1195_v57 = vld [vmem:[%s2585_s5 + $0xa8] sm:$0xff] }
  0x51   :  { %693 = vperm.xlu0 %1707, %v635_v58  }
  0x52   :  { %698 = vperm.xlu1 %1708, %v636_v59   ;;  %v1727_v59 = vld [vmem:[%s2583_s3 + $0x4] ss:$8 sps:$4 sm:$0xff]  }
  0x53   :  { %1013 = vmatprep.mubr.bf16.mxu0 %v1727_v59 }
  0x55   :  { %703 = vperm.xlu0 %1707, %v637_v60   ;;  %v1196_v60 = vld [vmem:[%s2585_s5 + $0xb0] sm:$0xff] }
  0x56   :  { %708 = vperm.xlu1 %1708, %v638_v61   ;;  %v1730_v61 = vld [vmem:[%s2583_s3 + $0x54] ss:$8 sps:$4 sm:$0xff]  }
  0x57   :  { %1053 = vmatprep.mubr.bf16.mxu1 %v1730_v61 }
  0x59   :  { %713 = vperm.xlu0 %1707, %v639_v62  }
  0x5a   :  { %718 = vperm.xlu1 %1708, %v640_v63   ;;  %v1197_v63 = vld [vmem:[%s2585_s5 + $0xb8] sm:$0xff] }
  0x5d   :  { %723 = vperm.xlu0 %1707, %v641_v0   ;;  %v1198_v0 = vld [vmem:[%s2585_s5 + $0xc0] sm:$0xff] }
  0x5e   :  { %728 = vperm.xlu1 %1708, %v642_v1  }
  0x61   :  { %733 = vperm.xlu0 %1707, %v643_v2   ;;  %v1199_v2 = vld [vmem:[%s2585_s5 + $0xc8] sm:$0xff] }
  0x62   :  { %738 = vperm.xlu1 %1708, %v644_v3  }
  0x65   :  { %743 = vperm.xlu0 %1707, %v645_v4   ;;  %v1200_v4 = vld [vmem:[%s2585_s5 + $0xd0] sm:$0xff] }
  0x66   :  { %748 = vperm.xlu1 %1708, %v646_v5   ;;  %v1201_v5 = vld [vmem:[%s2585_s5 + $0xd8] sm:$0xff] }
  0x69   :  { %753 = vperm.xlu0 %1707, %v647_v6  }
  0x6a   :  { %758 = vperm.xlu1 %1708, %v648_v7   ;;  %v659_v7 = vld [vmem:[%s2584_s4 + $0xf0] sm:$0xff] }
  0x6d   :  { %763 = vperm.xlu0 %1707, %v649_v8  }
  0x6e   :  { %768 = vperm.xlu1 %1708, %v650_v9   ;;  %v1202_v9 = vld [vmem:[%s2585_s5 + $0xe0] sm:$0xff] }
  0x71   :  { %773 = vperm.xlu0 %1707, %v651_v10   ;;  %v660_v10 = vld [vmem:[%s2584_s4 + $0xf8] sm:$0xff] }
  0x72   :  { %778 = vperm.xlu1 %1708, %v652_v11  }
  0x75   :  { %783 = vperm.xlu0 %1707, %v653_v12   ;;  %v1203_v12 = vld [vmem:[%s2585_s5 + $0xe8] sm:$0xff] }
  0x76   :  { %788 = vperm.xlu1 %1708, %v654_v13  }
  0x79   :  { %793 = vperm.xlu0 %1707, %v655_v14   ;;  %v1204_v14 = vld [vmem:[%s2585_s5 + $0xf0] sm:$0xff] }
  0x7a   :  { %798 = vperm.xlu1 %1708, %v656_v15   ;;  %v1205_v15 = vld [vmem:[%s2585_s5 + $0xf8] sm:$0xff] }
  0x7d   :  { %803 = vperm.xlu0 %1707, %v657_v16  }
  0x7e   :  { %808 = vperm.xlu1 %1708, %v658_v17   ;;  %v1435_v17 = vld [vmem:[#allocation2] sm:$0x1] }
  0x80   :  { %v2099_v20 = vpop.permute.xlu0 %247 }
  0x81   :  { %v2101_v21 = vpop.permute.xlu1 %167  ;;  %1208 = vperm.xlu0 %1707, %v1174_v18  }
  0x82   :  { %1213 = vperm.xlu1 %1708, %v1175_v19  }
  0x84   :  { %v2109_v24 = vpop.permute.xlu0 %252 }
  0x85   :  { %v2111_v25 = vpop.permute.xlu1 %172  ;;  %1218 = vperm.xlu0 %1707, %v1176_v22  }
  0x86   :  { %1223 = vperm.xlu1 %1708, %v1177_v23  }
  0x88   :  { %v2119_v28 = vpop.permute.xlu0 %237 }
  0x89   :  { %v2121_v29 = vpop.permute.xlu1 %242  ;;  %1228 = vperm.xlu0 %1707, %v1178_v26  }
  0x8a   :  { %1233 = vperm.xlu1 %1708, %v1179_v27  }
  0x8c   :  { %v2129_v32 = vpop.permute.xlu0 %157 }
  0x8d   :  { %v2131_v33 = vpop.permute.xlu1 %162  ;;  %1238 = vperm.xlu0 %1707, %v1180_v30  }
  0x8e   :  { %1243 = vperm.xlu1 %1708, %v1181_v31  }
  0x90   :  { %v2139_v36 = vpop.permute.xlu0 %227 }
  0x91   :  { %v2141_v37 = vpop.permute.xlu1 %232  ;;  %1248 = vperm.xlu0 %1707, %v1182_v34  }
  0x92   :  { %1253 = vperm.xlu1 %1708, %v1183_v35  }
  0x94   :  { %v2149_v40 = vpop.permute.xlu0 %147 }
  0x95   :  { %v2151_v41 = vpop.permute.xlu1 %152  ;;  %1258 = vperm.xlu0 %1707, %v1184_v38  }
  0x96   :  { %1263 = vperm.xlu1 %1708, %v1185_v39  }
  0x98   :  { %v2159_v44 = vpop.permute.xlu0 %217 }
  0x99   :  { %v2161_v45 = vpop.permute.xlu1 %222  ;;  %1268 = vperm.xlu0 %1707, %v1186_v42  }
  0x9a   :  { %1273 = vperm.xlu1 %1708, %v1187_v43  }
  0x9c   :  { %v2169_v48 = vpop.permute.xlu0 %137 }
  0x9d   :  { %1278 = vperm.xlu0 %1707, %v1188_v46   ;;  %v2174_v50 = vpop.permute.xlu1 %142 }
  0x9e   :  { %1283 = vperm.xlu1 %1708, %v1189_v47  }
  0xa0   :  { %v2182_v53 = vpop.permute.xlu0 %207 }
  0xa1   :  { %1288 = vperm.xlu0 %1707, %v1190_v49   ;;  %v2187_v55 = vpop.permute.xlu1 %212 }
  0xa2   :  { %1293 = vperm.xlu1 %1708, %v1191_v51  }
  0xa4   :  { %v128_v58 = vpop.permute.xlu0 %127 }
  0xa5   :  { %1298 = vperm.xlu0 %1707, %v1192_v52   ;;  %v133_v62 = vpop.permute.xlu1 %132 }
  0xa6   :  { %1303 = vperm.xlu1 %1708, %v1193_v54  }
  0xa8   :  { %v2210_v1 = vpop.permute.xlu0 %197 }
  0xa9   :  { %1308 = vperm.xlu0 %1707, %v1194_v56   ;;  %v2215_v3 = vpop.permute.xlu1 %202 }
  0xaa   :  { %1313 = vperm.xlu1 %1708, %v1195_v57  }
  0xac   :  { %v118_v6 = vpop.permute.xlu0 %117 }
  0xad   :  { %1318 = vperm.xlu0 %1707, %v1196_v60   ;;  %v123_v8 = vpop.permute.xlu1 %122 }
  0xae   :  { %1323 = vperm.xlu1 %1708, %v1197_v63  }
  0xb0   :  { %v2232_v11 = vpop.permute.xlu0 %187 }
  0xb1   :  { %1328 = vperm.xlu0 %1707, %v1198_v0   ;;  %v2237_v13 = vpop.permute.xlu1 %192 }
  0xb2   :  { %1333 = vperm.xlu1 %1708, %v1199_v2  }
  0xb4   :  { %v108_v16 = vpop.permute.xlu0 %107 }
  0xb5   :  { %1338 = vperm.xlu0 %1707, %v1200_v4   ;;  %v113_v18 = vpop.permute.xlu1 %112 }
  0xb6   :  { %1343 = vperm.xlu1 %1708, %v1201_v5  }
  0xb8   :  { %v2245_v19 = vpop.permute.xlu0 %177 }
  0xb9   :  { %813 = vperm.xlu0 %1707, %v659_v7   ;;  %v2247_v22 = vpop.permute.xlu1 %182 }
  0xba   :  { %1348 = vperm.xlu1 %1708, %v1202_v9  }
  0xbc   :  { %v98_v30 = vpop.permute.xlu0 %97 }
  0xbd   :  { %818 = vperm.xlu0 %1707, %v660_v10   ;;  %v103_v38 = vpop.permute.xlu1 %102 }
  0xbe   :  { %1353 = vperm.xlu1 %1708, %v1203_v12  }
  0xc1   :  { %1358 = vperm.xlu0 %1707, %v1204_v14  }
  0xc2   :  { %1363 = vperm.xlu1 %1708, %v1205_v15  }
  0xc5   :  { %1438 = vperm.xlu0 %1707, %v1435_v17  }
  0xc9   :  { %v1658_v23 = vpop.f32.mrf.mxu0 }
  0xca   :  { %v431_v27 = vadd.f32 %v1658_v23, %v108_v16 }
  0xcb   :  { %v422_v26 = vpop.f32.mrf.mxu0 }
  0xcc   :  { %v423_v34 = vadd.f32 %v422_v26, %v98_v30  ;;  %v551_v42 = vmax.f32 %v431_v27, 0.0 }
  0xcd   :  { %v1659_v31 = vpop.f32.mrf.mxu0 }
  0xce   :  { %v434_v35 = vadd.f32 %v1659_v31, %v113_v18  ;;  %v549_v49 = vmax.f32 %v423_v34, 0.0 }
  0xcf   :  { %v425_v39 = vpop.f32.mrf.mxu0 }
  0xd0   :  { %v552_v43 = vmax.f32 %v434_v35, 0.0  ;;  %v426_v46 = vadd.f32 %v425_v39, %v103_v38 }
  0xd1   :  { %v1662_v47 = vpop.f32.mrf.mxu0 }
  0xd2   :  { %v2249_v51 = vpack.c.bf16 %v552_v43, %v551_v42  ;;  %v550_v52 = vmax.f32 %v426_v46, 0.0  ;;  %v447_v57 = vadd.f32 %v1662_v47, %v128_v58 }
  0xd3   :  { %v438_v54 = vpop.f32.mrf.mxu0 }
  0xd4   :  { %v2251_v56 = vpack.c.bf16 %v550_v52, %v549_v49  ;;  %v439_v60 = vadd.f32 %v438_v54, %v118_v6  ;;  %v555_v0 = vmax.f32 %v447_v57, 0.0 }
  0xd5   :  { %v1663_v59 = vpop.f32.mrf.mxu0 }
  0xd6   :  { %v450_v61 = vadd.f32 %v1663_v59, %v133_v62  ;;  %v553_v7 = vmax.f32 %v439_v60, 0.0 }
  0xd7   :  { %v441_v63 = vpop.f32.mrf.mxu0 }
  0xd8   :  { %v556_v2 = vmax.f32 %v450_v61, 0.0  ;;  %v442_v4 = vadd.f32 %v441_v63, %v123_v8 }
  0xd9   :  { %v1666_v5 = vpop.f32.mrf.mxu0 }
  0xda   :  { %v2253_v9 = vpack.c.bf16 %v556_v2, %v555_v0  ;;  %v554_v10 = vmax.f32 %v442_v4, 0.0 }
  0xdb   :  { %v2255_v12 = vpop.f32.mrf.mxu0 }
  0xdc   :  { %v2257_v14 = vpack.c.bf16 %v554_v10, %v553_v7 }
  0xdd   :  { %v1667_v15 = vpop.f32.mrf.mxu0 }
  0xdf   :  { %v457_v16 = vpop.f32.mrf.mxu0 }
  0xe1   :  { %v1670_v17 = vpop.f32.mrf.mxu0 }
  0xe2   :  { %v479_v52 = vadd.f32 %v1670_v17, %v2101_v21 }
  0xe3   :  { %v470_v58 = vpop.f32.mrf.mxu0 }
  0xe4   :  { %v563_v7 = vmax.f32 %v479_v52, 0.0 }
  0xe5   :  { %v1671_v18 = vpop.f32.mrf.mxu0 }
  0xe6   :  { %v482_v46 = vadd.f32 %v1671_v18, %v2111_v25 }
  0xe7   :  { %v473_v6 = vpop.f32.mrf.mxu0 }
  0xe8   :  { %v564_v60 = vmax.f32 %v482_v46, 0.0  ;;  %v474_v61 = vadd.f32 %v473_v6, %v2131_v33 }
  0xe9   :  { %v2259_v62 = vpop.f32.mrf.mxu0 }
  0xea   :  { %v620_v18 = vpack.c.bf16 %v564_v60, %v563_v7  ;;  %v1741_v60 = vld [vmem:[%s2583_s3 + $0x20] ss:$8 sps:$4 sm:$0xff]   ;;  %v1751_v7 = vld [vmem:[%s2583_s3 + $0x94] ss:$8 sps:$4 sm:$0xff]  }
  0xeb   :  { %v2261_v23 = vpop.f32.mrf.mxu0 }
  0xed   :  { %v2263_v8 = vpop.f32.mrf.mxu0 }
  0xef   :  { %v2265_v26 = vpop.f32.mrf.mxu0 }
  0xf1   :  { %v1678_v27 = vpop.f32.mrf.mxu0 }
  0xf3   :  { %v2267_v30 = vpop.f32.mrf.mxu0 }
  0xf5   :  { %v1679_v31 = vpop.f32.mrf.mxu0 }
  0xf7   :  { %v505_v34 = vpop.f32.mrf.mxu0 }
  0xf9   :  { %v1682_v35 = vpop.f32.mrf.mxu0 }
  0xfa   :  { %v527_v21 = vadd.f32 %v1682_v35, %v2139_v36  ;;  %v514_v35 = vadd.f32 %v1679_v31, %v2187_v55 }
  0xfb   :  { %v518_v38 = vpop.f32.mrf.mxu0 }
  0xfc   :  { %v519_v36 = vadd.f32 %v518_v38, %v2159_v44 }
  0xfd   :  { %v1683_v39 = vpop.f32.mrf.mxu0 }
  0xfe   :  { %v530_v0 = vadd.f32 %v1683_v39, %v2141_v37 }
  0xff   :  { %v521_v42 = vpop.f32.mrf.mxu0 }
 0x100   :  { %v576_v33 = vmax.f32 %v530_v0, 0.0  ;;  %v522_v6 = vadd.f32 %v521_v42, %v2161_v45  ;;  %v1745_v0 = vld [vmem:[%s2583_s3 + $0x84] ss:$8 sps:$4 sm:$0xff]  }
 0x101   :  { %v1686_v43 = vpop.f32.mrf.mxu0 }
 0x102   :  { %v543_v49 = vadd.f32 %v1686_v43, %v2099_v20  ;;  %v471_v20 = vadd.f32 %v470_v58, %v2129_v32  ;;  %v562_v43 = vmax.f32 %v474_v61, 0.0  ;;  %v575_v32 = vmax.f32 %v527_v21, 0.0  ;;  %v1742_v61 = vld [vmem:[%s2583_s3 + $0x70] ss:$8 sps:$4 sm:$0xff]  }
 0x103   :  { %v534_v47 = vpop.f32.mrf.mxu0  ;;  %v574_v42 = vmax.f32 %v522_v6, 0.0  ;;  %v1754_v21 = vld [vmem:[%s2583_s3 + $0x90] ss:$8 sps:$4 sm:$0xff]  }
 0x104   :  { %v535_v57 = vadd.f32 %v534_v47, %v2119_v28  ;;  %v579_v2 = vmax.f32 %v543_v49, 0.0  ;;  %v561_v39 = vmax.f32 %v471_v20, 0.0  ;;  %v626_v45 = vpack.c.bf16 %v576_v33, %v575_v32  ;;  %v1753_v20 = vld [vmem:[%s2583_s3 + $0x40] ss:$8 sps:$4 sm:$0xff]   ;;  %v1764_v33 = vld [vmem:[%s2583_s3 + $0xd4] ss:$8 sps:$4 sm:$0xff]  }
 0x105   :  { %v1687_v54 = vpop.f32.mrf.mxu0  ;;  %v573_v47 = vmax.f32 %v519_v36, 0.0  ;;  %v572_v49 = vmax.f32 %v514_v35, 0.0  ;;  %v1766_v6 = vld [vmem:[%s2583_s3 + $0xd0] ss:$8 sps:$4 sm:$0xff]   ;;  %v2397_v36 = vpop.permute.xlu0 %663 }
 0x106   :  { %v546_v59 = vadd.f32 %v1687_v54, %v2109_v24  ;;  %v577_v10 = vmax.f32 %v535_v57, 0.0  ;;  %v466_v24 = vadd.f32 %v1667_v15, %v2151_v41  ;;  %v458_v41 = vadd.f32 %v457_v16, %v2174_v50  ;;  %v1772_v32 = vld [vmem:[%s2583_s3 + $0xf0] ss:$8 sps:$4 sm:$0xff]  }
 0x107   :  { %v537_v63 = vpop.f32.mrf.mxu0  ;;  %v619_v15 = vpack.c.bf16 %v562_v43, %v561_v39  ;;  %v506_v50 = vadd.f32 %v505_v34, %v2215_v3  ;;  %v625_v16 = vpack.c.bf16 %v574_v42, %v573_v47  ;;  %v495_v3 = vadd.f32 %v2259_v62, %v2232_v11  ;;  %v1763_v43 = vld [vmem:[%s2583_s3 + $0xc0] ss:$8 sps:$4 sm:$0xff]   ;;  %v1770_v39 = vld [vmem:[%s2583_s3 + $0xf4] ss:$8 sps:$4 sm:$0xff]  }
 0x108   :  { %v580_v4 = vmax.f32 %v546_v59, 0.0  ;;  %v538_v25 = vadd.f32 %v537_v63, %v2121_v29  ;;  %v463_v29 = vadd.f32 %v1666_v5, %v2149_v40  ;;  %v560_v58 = vmax.f32 %v466_v24, 0.0  ;;  %v1739_v59 = vld [vmem:[%s2583_s3 + $0x74] ss:$8 sps:$4 sm:$0xff]   ;;  %v1760_v24 = vld [vmem:[%s2583_s3 + $0xb0] ss:$8 sps:$4 sm:$0xff]  }
 0x109   :  { %v455_v40 = vadd.f32 %v2255_v12, %v2169_v48  ;;  %v511_v5 = vadd.f32 %v1678_v27, %v2182_v53  ;;  %v558_v38 = vmax.f32 %v458_v41, 0.0  ;;  %v503_v48 = vadd.f32 %v2267_v30, %v2210_v1  ;;  %v1743_v63 = vld [vmem:[%s2583_s3 + $0x34] ss:$8 sps:$4 sm:$0xff]   ;;  %v2399_v41 = vpop.permute.xlu0 %673 }
 0x10a   :  { %v628_v17 = vpack.c.bf16 %v580_v4, %v579_v2  ;;  %v578_v28 = vmax.f32 %v538_v25, 0.0  ;;  %v559_v46 = vmax.f32 %v463_v29, 0.0  ;;  %v498_v53 = vadd.f32 %v2263_v8, %v2237_v13  ;;  %v1747_v2 = vld [vmem:[%s2583_s3 + $0x30] ss:$8 sps:$4 sm:$0xff]   ;;  %v1748_v4 = vld [vmem:[%s2583_s3 + $0x80] ss:$8 sps:$4 sm:$0xff]  }
 0x10b   :  { %v557_v55 = vmax.f32 %v455_v40, 0.0  ;;  %v571_v31 = vmax.f32 %v511_v5, 0.0  ;;  %v570_v52 = vmax.f32 %v506_v50, 0.0  ;;  %v569_v34 = vmax.f32 %v503_v48, 0.0  ;;  %v1749_v25 = vld [vmem:[%s2583_s3 + $0x44] ss:$8 sps:$4 sm:$0xff]  }
 0x10c   :  { %v627_v37 = vpack.c.bf16 %v578_v28, %v577_v10  ;;  %1542 = vmatprep.subr.bf16.mxu0 %v628_v17  ;;  %1688 = vmatprep.subr.bf16.mxu1 %v628_v17  ;;  %v618_v44 = vpack.c.bf16 %v560_v58, %v559_v46  ;;  %v568_v54 = vmax.f32 %v498_v53, 0.0  ;;  %v490_v1 = vadd.f32 %v2265_v26, %v2247_v22  ;;  %v1737_v26 = vld [vmem:[%s2583_s3 + $0x24] ss:$8 sps:$4 sm:$0xff]   ;;  %v1757_v17 = vld [vmem:[%s2583_s3 + $0xa0] ss:$8 sps:$4 sm:$0xff]   ;;  %v669_v58 = vpop.permute.xlu1 %668 }
 0x10d   :  { %1543 = vmatpush3.bf16.msra.mxu0 %v620_v18  ;;  %1696 = vmatpush3.bf16.msra.mxu1 %v620_v18  ;;  %v617_v12 = vpack.c.bf16 %v558_v38, %v557_v55  ;;  %v624_v27 = vpack.c.bf16 %v572_v49, %v571_v31  ;;  %v623_v30 = vpack.c.bf16 %v570_v52, %v569_v34  ;;  %v567_v13 = vmax.f32 %v495_v3, 0.0  ;;  %v1755_v10 = vld [vmem:[%s2583_s3 + $0xa4] ss:$8 sps:$4 sm:$0xff]   ;;  %v1758_v28 = vld [vmem:[%s2583_s3 + $0xb4] ss:$8 sps:$4 sm:$0xff]   ;;  %v2403_v35 = vpop.permute.xlu0 %683 }
 0x10e   :  { %1544 = vmatprep.subr.bf16.mxu0 %v627_v37  ;;  %1689 = vmatprep.subr.bf16.mxu1 %v627_v37  ;;  %v487_v8 = vadd.f32 %v2261_v23, %v2245_v19  ;;  %v566_v11 = vmax.f32 %v490_v1, 0.0  ;;  %v1725_v19 = vld [vmem:[%s2583_s3] ss:$8 sps:$4 sm:$0xff]   ;;  %v1735_v23 = vld [vmem:[%s2583_s3 + $0x10] ss:$8 sps:$4 sm:$0xff]  }
 0x10f   :  { %v622_v57 = vpack.c.bf16 %v568_v54, %v567_v13  ;;  %v1761_v18 = vld [vmem:[%s2583_s3 + $0xc4] ss:$8 sps:$4 sm:$0xff]   ;;  %v1769_v29 = vld [vmem:[%s2583_s3 + $0xe0] ss:$8 sps:$4 sm:$0xff]  }
 0x110   :  { %v565_v62 = vmax.f32 %v487_v8, 0.0  ;;  %v1767_v37 = vld [vmem:[%s2583_s3 + $0xe4] ss:$8 sps:$4 sm:$0xff]  }
 0x111   :  { %1545 = vmatpush3.bf16.msra.mxu0 %v619_v15  ;;  %1697 = vmatpush3.bf16.msra.mxu1 %v619_v15  ;;  %v2401_v15 = vpop.permute.xlu1 %678  ;;  %v2407_v42 = vpop.permute.xlu0 %693 }
 0x112   :  { %1546 = vmatprep.subr.bf16.mxu0 %v626_v45  ;;  %1690 = vmatprep.subr.bf16.mxu1 %v626_v45  ;;  %v621_v22 = vpack.c.bf16 %v566_v11, %v565_v62 }
 0x115   :  { %1547 = vmatpush3.bf16.msra.mxu0 %v618_v44  ;;  %1698 = vmatpush3.bf16.msra.mxu1 %v618_v44  ;;  %v2405_v45 = vpop.permute.xlu1 %688  ;;  %v2411_v40 = vpop.permute.xlu0 %703 }
 0x116   :  { %1548 = vmatprep.subr.bf16.mxu0 %v625_v16  ;;  %1691 = vmatprep.subr.bf16.mxu1 %v625_v16 }
 0x119   :  { %1549 = vmatpush3.bf16.msra.mxu0 %v617_v12  ;;  %1699 = vmatpush3.bf16.msra.mxu1 %v617_v12  ;;  %v2409_v46 = vpop.permute.xlu1 %698  ;;  %v2415_v47 = vpop.permute.xlu0 %713 }
 0x11a   :  { %1550 = vmatprep.subr.bf16.mxu0 %v624_v27  ;;  %1692 = vmatprep.subr.bf16.mxu1 %v624_v27 }
 0x11d   :  { %1551 = vmatpush3.bf16.msra.mxu0 %v2253_v9  ;;  %1700 = vmatpush3.bf16.msra.mxu1 %v2253_v9  ;;  %v1728_v9 = vld [vmem:[%s2583_s3 + $0x50] ss:$8 sps:$4 sm:$0xff]   ;;  %v2413_v5 = vpop.permute.xlu1 %708  ;;  %v2419_v38 = vpop.permute.xlu0 %723 }
 0x11e   :  { %1552 = vmatprep.subr.bf16.mxu0 %v623_v30  ;;  %1693 = vmatprep.subr.bf16.mxu1 %v623_v30 }
 0x121   :  { %1553 = vmatpush3.bf16.msra.mxu0 %v2257_v14  ;;  %1701 = vmatpush3.bf16.msra.mxu1 %v2257_v14  ;;  %v1731_v14 = vld [vmem:[%s2583_s3 + $0x14] ss:$8 sps:$4 sm:$0xff]   ;;  %v2417_v44 = vpop.permute.xlu1 %718  ;;  %v2423_v50 = vpop.permute.xlu0 %733 }
 0x122   :  { %1554 = vmatprep.subr.bf16.mxu0 %v622_v57  ;;  %1694 = vmatprep.subr.bf16.mxu1 %v622_v57 }
 0x125   :  { %1555 = vmatpush3.bf16.msra.mxu0 %v2249_v51  ;;  %1702 = vmatpush3.bf16.msra.mxu1 %v2249_v51  ;;  %v1733_v51 = vld [vmem:[%s2583_s3 + $0x64] ss:$8 sps:$4 sm:$0xff]   ;;  %v2421_v49 = vpop.permute.xlu1 %728  ;;  %v2427_v55 = vpop.permute.xlu0 %743 }
 0x126   :  { %1556 = vmatprep.subr.bf16.mxu0 %v621_v22  ;;  %1695 = vmatprep.subr.bf16.mxu1 %v621_v22 }
 0x129   :  { %1557 = vmatpush3.bf16.msra.mxu0 %v2251_v56  ;;  %1703 = vmatpush3.bf16.msra.mxu1 %v2251_v56  ;;  %v1736_v56 = vld [vmem:[%s2583_s3 + $0x60] ss:$8 sps:$4 sm:$0xff]   ;;  %v2425_v16 = vpop.permute.xlu1 %738  ;;  %v2431_v48 = vpop.permute.xlu0 %753  ;;  %s1796_s3 = smov [#allocation3]  }
 0x12a   :  { %s1453_s21 = sshll.u32 %s1796_s3, 4  ;;  %s1454_s21 = int_to_ptr.vmem [resolvable:$true] %s1453_s21 }
 0x12b   :  { %s1773_s22 = scalar_lea.vmem %s1454_s21, 16  ;;  %s1777_s23 = scalar_lea.vmem %s1454_s21, 32 }
 0x12c   :  { %1014 = vmatmul.mubr.bf16.vlgmr.msra.gmra.mxu0 %v1725_v19  ;;  %1054 = vmatmul.mubr.bf16.vlgmr.msra.gmra.mxu1 %v1728_v9  ;;  %p1774_p0 = scmp.ne.s32.totalorder %s1454_s21, %s1773_s22  ;;  %p1778_p1 = scmp.lt.s32.totalorder %s1454_s21, %s1454_s21 }
 0x12d   :  { %1021 = vmatprep.mubr.bf16.mxu0 %v1731_v14  ;;  %1061 = vmatprep.mubr.bf16.mxu1 %v1733_v51  ;;  %v2429_v31 = vpop.permute.xlu1 %748  ;;  %v2435_v53 = vpop.permute.xlu0 %763  ;;  %p1779_p2 = scmp.lt.s32.totalorder %s1777_s23, %s1773_s22 }
 0x12e   :  { %2588 = vst [vmem:[#allocation6_spill] sm:$0xff] %v2435_v53 }
 0x12f   :  { %p1780_p3 = por %p1779_p2, %p1778_p1 }
 0x131   :  { %v2433_v12 = vpop.permute.xlu1 %758  ;;  %v2439_v52 = vpop.permute.xlu0 %773  ;;  %p1781_p4 = pnand %p1780_p3, %p1774_p0 }
 0x132   :  { %2590 = vst [vmem:[#allocation8_spill] sm:$0xff] %v2439_v52 }
 0x134   :  { %1022 = vmatmul.mubr.bf16.gmra.mxu0 %v1735_v23  ;;  %1062 = vmatmul.mubr.bf16.gmra.mxu1 %v1736_v56 }
 0x135   :  { %1029 = vmatprep.mubr.bf16.mxu0 %v1737_v26  ;;  %1069 = vmatprep.mubr.bf16.mxu1 %v1739_v59  ;;  %v2437_v27 = vpop.permute.xlu1 %768  ;;  %v2443_v34 = vpop.permute.xlu0 %783 }
 0x136   :  { %2589 = vst [vmem:[#allocation7_spill] sm:$0xff] %v2437_v27  ;;  %2592 = vst [vmem:[#allocation10_spill] sm:$0xff] %v2443_v34 }
 0x139   :  { %v2441_v3 = vpop.permute.xlu1 %778  ;;  %v2447_v1 = vpop.permute.xlu0 %793 }
 0x13a   :  { %2591 = vst [vmem:[#allocation9_spill] sm:$0xff] %v2441_v3  ;;  %2594 = vst [vmem:[#allocation12_spill] sm:$0xff] %v2447_v1 }
 0x13c   :  { %1030 = vmatmul.mubr.bf16.gmra.mxu0 %v1741_v60  ;;  %1070 = vmatmul.mubr.bf16.gmra.mxu1 %v1742_v61 }
 0x13d   :  { %1037 = vmatprep.mubr.bf16.mxu0 %v1743_v63  ;;  %1077 = vmatprep.mubr.bf16.mxu1 %v1745_v0  ;;  %v2445_v54 = vpop.permute.xlu1 %788  ;;  %v2451_v13 = vpop.permute.xlu0 %803 }
 0x13e   :  { %2593 = vst [vmem:[#allocation11_spill] sm:$0xff] %v2445_v54  ;;  %2596 = vst [vmem:[#allocation14_spill] sm:$0xff] %v2451_v13 }
 0x141   :  { %v2449_v30 = vpop.permute.xlu1 %798  ;;  %v1209_v57 = vpop.permute.xlu0 %1208 }
 0x142   :  { %2595 = vst [vmem:[#allocation13_spill] sm:$0xff] %v2449_v30 }
 0x144   :  { %1038 = vmatmul.mubr.bf16.gmra.mxu0 %v1747_v2  ;;  %1078 = vmatmul.mubr.bf16.gmra.mxu1 %v1748_v4 }
 0x145   :  { %1045 = vmatprep.mubr.bf16.mxu0 %v1749_v25  ;;  %1085 = vmatprep.mubr.bf16.mxu1 %v1751_v7  ;;  %v2453_v8 = vpop.permute.xlu1 %808  ;;  %v1219_v62 = vpop.permute.xlu0 %1218 }
 0x146   :  { %2597 = vst [vmem:[#allocation15_spill] sm:$0xff] %v2453_v8 }
 0x149   :  { %v1214_v11 = vpop.permute.xlu1 %1213  ;;  %v2461_v23 = vpop.permute.xlu0 %1228 }
 0x14c   :  { %1046 = vmatmul.mubr.bf16.gmra.mxu0 %v1753_v20  ;;  %1086 = vmatmul.mubr.bf16.gmra.mxu1 %v1754_v21 }
 0x14d   :  { %1093 = vmatprep.mubr.bf16.mxu1 %v1755_v10  ;;  %v2457_v9 = vpop.permute.xlu1 %1223  ;;  %v2471_v2 = vpop.permute.xlu0 %1238 }
 0x151   :  { %v2467_v61 = vpop.permute.xlu1 %1233 }
 0x154   :  { %1094 = vmatmul.mubr.bf16.gmra.mxu1 %v1757_v17 }
 0x155   :  { %1101 = vmatprep.mubr.bf16.mxu1 %v1758_v28  ;;  %v2477_v21 = vpop.permute.xlu1 %1243  ;;  %v2481_v28 = vpop.permute.xlu0 %1248 }
 0x159   :  { %v2491_v1 = vpop.permute.xlu0 %1258 }
 0x15c   :  { %1102 = vmatmul.mubr.bf16.gmra.mxu1 %v1760_v24 }
 0x15d   :  { %1109 = vmatprep.mubr.bf16.mxu1 %v1761_v18 }
 0x164   :  { %1110 = vmatmul.mubr.bf16.gmra.mxu1 %v1763_v43 }
 0x165   :  { %1117 = vmatprep.mubr.bf16.mxu1 %v1764_v33 }
 0x16c   :  { %1118 = vmatmul.mubr.bf16.gmra.mxu1 %v1766_v6 }
 0x16d   :  { %1125 = vmatprep.mubr.bf16.mxu1 %v1767_v37 }
 0x174   :  { %1126 = vmatmul.mubr.bf16.gmra.mxu1 %v1769_v29 }
 0x175   :  { %1133 = vmatprep.mubr.bf16.mxu1 %v1770_v39  ;;  %v2487_v39 = vpop.permute.xlu1 %1253 }
 0x17c   :  { %1134 = vmatmul.mubr.bf16.gmra.mxu1 %v1772_v32 }
 0x1ec   :  { %v1558_v22 = vpop.f32.mrf.mxu0  ;;  %v2455_v19 = vpop.f32.mrf.mxu1 }
 0x1ee   :  { %v1559_v14 = vpop.f32.mrf.mxu0  ;;  %v2459_v51 = vpop.f32.mrf.mxu1 }
 0x1ef   :  { %v1560_v33 = vadd.f32 %v1559_v14, %v1558_v22 }
 0x1f0   :  { %v1561_v56 = vpop.f32.mrf.mxu0  ;;  %v2463_v26 = vpop.f32.mrf.mxu1 }
 0x1f1   :  { %v1016_v54 = vadd.f32 %v1560_v33, %v2397_v36 }
 0x1f2   :  { %v1562_v59 = vpop.f32.mrf.mxu0  ;;  %v2465_v60 = vpop.f32.mrf.mxu1 }
 0x1f3   :  { %v1563_v24 = vadd.f32 %v1562_v59, %v1561_v56 }
 0x1f4   :  { %v1564_v63 = vpop.f32.mrf.mxu0  ;;  %v2469_v0 = vpop.f32.mrf.mxu1 }
 0x1f5   :  { %v1019_v32 = vadd.f32 %v1563_v24, %v669_v58 }
 0x1f6   :  { %v1565_v4 = vpop.f32.mrf.mxu0  ;;  %v2473_v25 = vpop.f32.mrf.mxu1 }
 0x1f7   :  { %v1566_v6 = vadd.f32 %v1565_v4, %v1564_v63  ;;  %v1143_v14 = vmax.f32 %v1019_v32, 0.0 }
 0x1f8   :  { %v1567_v7 = vpop.f32.mrf.mxu0  ;;  %v2475_v20 = vpop.f32.mrf.mxu1 }
 0x1f9   :  { %v1024_v56 = vadd.f32 %v1566_v6, %v2399_v41  ;;  %v2505_v41 = vpop.permute.xlu0 %1268 }
 0x1fa   :  { %v1568_v10 = vpop.f32.mrf.mxu0  ;;  %v2479_v17 = vpop.f32.mrf.mxu1 }
 0x1fb   :  { %v1569_v8 = vadd.f32 %v1568_v10, %v1567_v7  ;;  %v2500_v7 = vpop.permute.xlu1 %1263  ;;  %v1142_v10 = vmax.f32 %v1016_v54, 0.0  ;;  %v1144_v24 = vmax.f32 %v1024_v56, 0.0 }
 0x1fc   :  { %v1570_v18 = vpop.f32.mrf.mxu0  ;;  %v2483_v43 = vpop.f32.mrf.mxu1 }
 0x1fd   :  { %v1027_v63 = vadd.f32 %v1569_v8, %v2401_v15  ;;  %v1366_v8 = vmul.f32 %v1209_v57, %v1142_v10  ;;  %v1368_v32 = vmul.f32 %v1219_v62, %v1144_v24  ;;  %v1590_v10 = vadd.f32 %v2459_v51, %v2455_v19 }
 0x1fe   :  { %v1571_v37 = vpop.f32.mrf.mxu0  ;;  %v2485_v29 = vpop.f32.mrf.mxu1  ;;  %v1596_v51 = vadd.f32 %v2473_v25, %v2469_v0 }
 0x1ff   :  { %v1572_v59 = vadd.f32 %v1571_v37, %v1570_v18  ;;  %v1367_v18 = vmul.f32 %v1214_v11, %v1143_v14  ;;  %v1145_v6 = vmax.f32 %v1027_v63, 0.0  ;;  %v1056_v19 = vadd.f32 %v1590_v10, %v2415_v47 }
 0x200   :  { %v1573_v13 = vpop.f32.mrf.mxu0  ;;  %v2489_v30 = vpop.f32.mrf.mxu1  ;;  %v1602_v25 = vadd.f32 %v2485_v29, %v2483_v43 }
 0x201   :  { %v1032_v52 = vadd.f32 %v1572_v59, %v2403_v35  ;;  %v2513_v59 = vpop.permute.xlu1 %1273  ;;  %v1398_v53 = vadd.f32 %v1367_v18, %v1366_v8  ;;  %v1369_v11 = vmul.f32 %v2457_v9, %v1145_v6 }
 0x202   :  { %v1574_v34 = vpop.f32.mrf.mxu0  ;;  %v2495_v22 = vpop.f32.mrf.mxu1  ;;  %v1072_v43 = vadd.f32 %v1602_v25, %v2423_v50  ;;  %v2598_v25 = vld [vmem:[#allocation6_spill] sm:$0xff] }
 0x203   :  { %v1575_v4 = vadd.f32 %v1574_v34, %v1573_v13  ;;  %v1146_v27 = vmax.f32 %v1032_v52, 0.0  ;;  %v1399_v57 = vadd.f32 %v1398_v53, %v1368_v32 }
 0x204   :  { %v1576_v3 = vpop.f32.mrf.mxu0  ;;  %v2498_v58 = vpop.f32.mrf.mxu1  ;;  %v1156_v50 = vmax.f32 %v1072_v43, 0.0 }
 0x205   :  { %v1035_v37 = vadd.f32 %v1575_v4, %v2405_v45  ;;  %v2518_v4 = vpop.permute.xlu0 %1278  ;;  %v1370_v52 = vmul.f32 %v2461_v23, %v1146_v27  ;;  %v1400_v18 = vadd.f32 %v1399_v57, %v1369_v11  ;;  %v2527_v8 = vpop.permute.xlu1 %1283  ;;  %v1064_v57 = vadd.f32 %v1596_v51, %v2419_v38 }
 0x206   :  { %v1577_v36 = vpop.f32.mrf.mxu0  ;;  %v2503_v33 = vpop.f32.mrf.mxu1 }
 0x207   :  { %v1578_v15 = vadd.f32 %v1577_v36, %v1576_v3  ;;  %v1147_v14 = vmax.f32 %v1035_v37, 0.0  ;;  %v1401_v27 = vadd.f32 %v1400_v18, %v1370_v52  ;;  %v1154_v38 = vmax.f32 %v1064_v57, 0.0 }
 0x208   :  { %v1579_v34 = vpop.f32.mrf.mxu0  ;;  %v2508_v13 = vpop.f32.mrf.mxu1 }
 0x209   :  { %v1040_v54 = vadd.f32 %v1578_v15, %v2407_v42  ;;  %v1371_v9 = vmul.f32 %v2467_v61, %v1147_v14  ;;  %v1593_v15 = vadd.f32 %v2465_v60, %v2463_v26  ;;  %v2535_v11 = vpop.permute.xlu0 %1288 }
 0x20a   :  { %v1580_v56 = vpop.f32.mrf.mxu0  ;;  %v2511_v35 = vpop.f32.mrf.mxu1 }
 0x20b   :  { %v1581_v63 = vadd.f32 %v1580_v56, %v1579_v34  ;;  %v1148_v62 = vmax.f32 %v1040_v54, 0.0  ;;  %v1402_v54 = vadd.f32 %v1401_v27, %v1371_v9  ;;  %v1059_v14 = vadd.f32 %v1593_v15, %v2417_v44 }
 0x20c   :  { %v1582_v45 = vpop.f32.mrf.mxu0  ;;  %v2516_v3 = vpop.f32.mrf.mxu1  ;;  %v1608_v9 = vadd.f32 %v2503_v33, %v2498_v58 }
 0x20d   :  { %v1043_v42 = vadd.f32 %v1581_v63, %v2409_v46  ;;  %v1372_v46 = vmul.f32 %v2471_v2, %v1148_v62  ;;  %v1153_v44 = vmax.f32 %v1059_v14, 0.0 }
 0x20e   :  { %v1583_v24 = vpop.f32.mrf.mxu0  ;;  %v1613_v36 = vpop.f32.mrf.mxu1 }
 0x20f   :  { %v1149_v6 = vmax.f32 %v1043_v42, 0.0  ;;  %v1584_v37 = vadd.f32 %v1583_v24, %v1582_v45  ;;  %v1403_v2 = vadd.f32 %v1402_v54, %v1372_v46  ;;  %v1294_v42 = vpop.permute.xlu1 %1293  ;;  %v1080_v46 = vadd.f32 %v1608_v9, %v2427_v55 }
 0x210   :  { %v1585_v34 = vpop.f32.mrf.mxu0  ;;  %v1615_v53 = vpop.f32.mrf.mxu1  ;;  %v1614_v58 = vadd.f32 %v1613_v36, %v2516_v3 }
 0x211   :  { %v1048_v23 = vadd.f32 %v1584_v37, %v2411_v40  ;;  %v1373_v56 = vmul.f32 %v2477_v21, %v1149_v6  ;;  %v1599_v40 = vadd.f32 %v2479_v17, %v2475_v20  ;;  %v1152_v21 = vmax.f32 %v1056_v19, 0.0 }
 0x212   :  { %v1586_v61 = vpop.f32.mrf.mxu0  ;;  %v1616_v32 = vpop.f32.mrf.mxu1  ;;  %v1605_v20 = vadd.f32 %v2495_v22, %v2489_v30  ;;  %v1377_v37 = vmul.f32 %v2500_v7, %v1153_v44  ;;  %v2600_v44 = vld [vmem:[#allocation8_spill] sm:$0xff] }
 0x213   :  { %v1150_v26 = vmax.f32 %v1048_v23, 0.0  ;;  %v1587_v60 = vadd.f32 %v1586_v61, %v1585_v34  ;;  %v1404_v52 = vadd.f32 %v1403_v2, %v1373_v56  ;;  %v1067_v24 = vadd.f32 %v1599_v40, %v2421_v49  ;;  %v1304_v34 = vpop.permute.xlu1 %1303 }
 0x214   :  { %v1618_v63 = vpop.f32.mrf.mxu1  ;;  %v1376_v18 = vmul.f32 %v2491_v1, %v1152_v21  ;;  %v1075_v30 = vadd.f32 %v1605_v20, %v2425_v16  ;;  %v1378_v1 = vmul.f32 %v2505_v41, %v1154_v38  ;;  %v1617_v7 = vadd.f32 %v1616_v32, %v1615_v53 }
 0x215   :  { %v1374_v47 = vmul.f32 %v2481_v28, %v1150_v26  ;;  %v1051_v0 = vadd.f32 %v1587_v60, %v2413_v5  ;;  %v1299_v28 = vpop.permute.xlu0 %1298  ;;  %v1155_v15 = vmax.f32 %v1067_v24, 0.0  ;;  %v1158_v56 = vmax.f32 %v1080_v46, 0.0 }
 0x216   :  { %v1619_v45 = vpop.f32.mrf.mxu1  ;;  %v1157_v16 = vmax.f32 %v1075_v30, 0.0  ;;  %v1088_v41 = vadd.f32 %v1614_v58, %v2431_v48  ;;  %v1091_v3 = vadd.f32 %v1617_v7, %v2433_v12  ;;  %v2599_v12 = vld [vmem:[#allocation7_spill] sm:$0xff] }
 0x217   :  { %v1151_v62 = vmax.f32 %v1051_v0, 0.0  ;;  %v1405_v17 = vadd.f32 %v1404_v52, %v1374_v47  ;;  %v1379_v51 = vmul.f32 %v2513_v59, %v1155_v15  ;;  %v1620_v55 = vadd.f32 %v1619_v45, %v1618_v63  ;;  %v1314_v60 = vpop.permute.xlu1 %1313  ;;  %v2603_v7 = vld [vmem:[#allocation11_spill] sm:$0xff] }
 0x218   :  { %v1621_v10 = vpop.f32.mrf.mxu1  ;;  %v1381_v53 = vmul.f32 %v2527_v8, %v1157_v16  ;;  %v1160_v47 = vmax.f32 %v1088_v41, 0.0  ;;  %v1161_v21 = vmax.f32 %v1091_v3, 0.0  ;;  %v2605_v3 = vld [vmem:[#allocation13_spill] sm:$0xff] }
 0x219   :  { %v1375_v5 = vmul.f32 %v2487_v39, %v1151_v62  ;;  %v1611_v39 = vadd.f32 %v2511_v35, %v2508_v13  ;;  %v1309_v23 = vpop.permute.xlu0 %1308  ;;  %v1380_v35 = vmul.f32 %v2518_v4, %v1156_v50  ;;  %v1382_v4 = vmul.f32 %v2535_v11, %v1158_v56 }
 0x21a   :  { %v1622_v29 = vpop.f32.mrf.mxu1  ;;  %v1096_v48 = vadd.f32 %v1620_v55, %v2598_v25  ;;  %v1384_v20 = vmul.f32 %v1299_v28, %v1160_v47  ;;  %v2606_v25 = vld [vmem:[#allocation14_spill] sm:$0xff] }
 0x21b   :  { %v1406_v6 = vadd.f32 %v1405_v17, %v1375_v5  ;;  %v1083_v61 = vadd.f32 %v1611_v39, %v2429_v31  ;;  %v1623_v14 = vadd.f32 %v1622_v29, %v1621_v10  ;;  %v1324_v8 = vpop.permute.xlu1 %1323  ;;  %v1385_v29 = vmul.f32 %v1304_v34, %v1161_v21 }
 0x21c   :  { %v1624_v49 = vpop.f32.mrf.mxu1  ;;  %v1162_v5 = vmax.f32 %v1096_v48, 0.0 }
 0x21d   :  { %v1407_v22 = vadd.f32 %v1406_v6, %v1376_v18  ;;  %v1159_v32 = vmax.f32 %v1083_v61, 0.0  ;;  %v1319_v40 = vpop.permute.xlu0 %1318  ;;  %v1099_v52 = vadd.f32 %v1623_v14, %v2599_v12  ;;  %v2601_v6 = vld [vmem:[#allocation9_spill] sm:$0xff] }
 0x21e   :  { %v1625_v27 = vpop.f32.mrf.mxu1  ;;  %v1386_v39 = vmul.f32 %v1309_v23, %v1162_v5 }
 0x21f   :  { %v1408_v33 = vadd.f32 %v1407_v22, %v1377_v37  ;;  %v1626_v31 = vadd.f32 %v1625_v27, %v1624_v49  ;;  %v1383_v45 = vmul.f32 %v1294_v42, %v1159_v32  ;;  %v1163_v9 = vmax.f32 %v1099_v52, 0.0  ;;  %v2602_v22 = vld [vmem:[#allocation10_spill] sm:$0xff] }
 0x220   :  { %v1627_v19 = vpop.f32.mrf.mxu1 }
 0x221   :  { %v1409_v13 = vadd.f32 %v1408_v33, %v1378_v1  ;;  %v1104_v24 = vadd.f32 %v1626_v31, %v2600_v44  ;;  %v1329_v11 = vpop.permute.xlu0 %1328  ;;  %v1334_v1 = vpop.permute.xlu1 %1333  ;;  %v1387_v58 = vmul.f32 %v1314_v60, %v1163_v9 }
 0x222   :  { %v1628_v54 = vpop.f32.mrf.mxu1 }
 0x223   :  { %v1410_v26 = vadd.f32 %v1409_v13, %v1379_v51  ;;  %v1629_v62 = vadd.f32 %v1628_v54, %v1627_v19  ;;  %v1164_v49 = vmax.f32 %v1104_v24, 0.0  ;;  %v2607_v24 = vld [vmem:[#allocation15_spill] sm:$0xff] }
 0x224   :  { %v1630_v36 = vpop.f32.mrf.mxu1 }
 0x225   :  { %v1411_v59 = vadd.f32 %v1410_v26, %v1380_v35  ;;  %v1107_v37 = vadd.f32 %v1629_v62, %v2601_v6  ;;  %v1339_v19 = vpop.permute.xlu0 %1338  ;;  %v1388_v51 = vmul.f32 %v1319_v40, %v1164_v49  ;;  %v2604_v35 = vld [vmem:[#allocation12_spill] sm:$0xff] }
 0x226   :  { %v1631_v2 = vpop.f32.mrf.mxu1 }
 0x227   :  { %v1412_v0 = vadd.f32 %v1411_v59, %v1381_v53  ;;  %v1632_v43 = vadd.f32 %v1631_v2, %v1630_v36  ;;  %v1165_v33 = vmax.f32 %v1107_v37, 0.0  ;;  %v1344_v53 = vpop.permute.xlu1 %1343 }
 0x228   :  { %v1633_v63 = vpop.f32.mrf.mxu1 }
 0x229   :  { %v1413_v57 = vadd.f32 %v1412_v0, %v1382_v4  ;;  %v1112_v50 = vadd.f32 %v1632_v43, %v2602_v22  ;;  %v1389_v26 = vmul.f32 %v1324_v8, %v1165_v33  ;;  %v814_v2 = vpop.permute.xlu0 %813 }
 0x22a   :  { %v1634_v10 = vpop.f32.mrf.mxu1 }
 0x22b   :  { %v1414_v17 = vadd.f32 %v1413_v57, %v1383_v45  ;;  %v1635_v42 = vadd.f32 %v1634_v10, %v1633_v63  ;;  %v1166_v13 = vmax.f32 %v1112_v50, 0.0  ;;  %v1349_v12 = vpop.permute.xlu1 %1348 }
 0x22c   :  { %v1636_v18 = vpop.f32.mrf.mxu1 }
 0x22d   :  { %v1415_v38 = vadd.f32 %v1414_v17, %v1384_v20  ;;  %v1115_v34 = vadd.f32 %v1635_v42, %v2603_v7  ;;  %v1390_v59 = vmul.f32 %v1329_v11, %v1166_v13  ;;  %v819_v20 = vpop.permute.xlu0 %818 }
 0x22e   :  { %v1637_v15 = vpop.f32.mrf.mxu1 }
 0x22f   :  { %v1416_v30 = vadd.f32 %v1415_v38, %v1385_v29  ;;  %v1638_v27 = vadd.f32 %v1637_v15, %v1636_v18  ;;  %v1167_v55 = vmax.f32 %v1115_v34, 0.0  ;;  %v1354_v9 = vpop.permute.xlu1 %1353 }
 0x230   :  { %v1639_v28 = vpop.f32.mrf.mxu1 }
 0x231   :  { %v1417_v46 = vadd.f32 %v1416_v30, %v1386_v39  ;;  %v1120_v54 = vadd.f32 %v1638_v27, %v2604_v35  ;;  %v1391_v47 = vmul.f32 %v1334_v1, %v1167_v55  ;;  %v1359_v30 = vpop.permute.xlu0 %1358 }
 0x232   :  { %v1640_v16 = vpop.f32.mrf.mxu1 }
 0x233   :  { %v1418_v61 = vadd.f32 %v1417_v46, %v1387_v58  ;;  %v1641_v56 = vadd.f32 %v1640_v16, %v1639_v28  ;;  %v1168_v14 = vmax.f32 %v1120_v54, 0.0  ;;  %v1364_v1 = vpop.permute.xlu1 %1363  ;;  %v1441_v58 = vlaneseq }
 0x234   :  { %v1642_v41 = vpop.f32.mrf.mxu1 }
 0x235   :  { %v1419_v23 = vadd.f32 %v1418_v61, %v1388_v51  ;;  %v1123_v36 = vadd.f32 %v1641_v56, %v2605_v3  ;;  %v1392_v45 = vmul.f32 %v1339_v19, %v1168_v14  ;;  %v1442_v34 = vshrl.u32 %v1441_v58, 7  ;;  %v1439_v13 = vpop.permute.xlu0 %1438 }
 0x236   :  { %v1643_v32 = vpop.f32.mrf.mxu1 }
 0x237   :  { %v1420_v60 = vadd.f32 %v1419_v23, %v1389_v26  ;;  %v1644_v31 = vadd.f32 %v1643_v32, %v1642_v41  ;;  %v1169_v0 = vmax.f32 %v1123_v36, 0.0  ;;  %v1443_v16 = vsub.s32 0, %v1442_v34 }
 0x238   :  { %v1645_v40 = vpop.f32.mrf.mxu1 }
 0x239   :  { %v1421_v4 = vadd.f32 %v1420_v60, %v1390_v59  ;;  %v1128_v48 = vadd.f32 %v1644_v31, %v2606_v25  ;;  %v1393_v8 = vmul.f32 %v1344_v53, %v1169_v0  ;;  %v1444_v54 = vrot.slane %v1439_v13, %v1443_v16 }
 0x23a   :  { %v1646_v21 = vpop.f32.mrf.mxu1 }
 0x23b   :  { %v1422_v63 = vadd.f32 %v1421_v4, %v1391_v47  ;;  %v1647_v57 = vadd.f32 %v1646_v21, %v1645_v40  ;;  %v1170_v44 = vmax.f32 %v1128_v48, 0.0 }
 0x23c   :  { %v1648_v52 = vpop.f32.mrf.mxu1 }
 0x23d   :  { %v1423_v62 = vadd.f32 %v1422_v63, %v1392_v45  ;;  %v1131_v10 = vadd.f32 %v1647_v57, %v2607_v24  ;;  %v1394_v18 = vmul.f32 %v1349_v12, %v1170_v44 }
 0x23e   :  { %v1649_v17 = vpop.f32.mrf.mxu1 }
 0x23f   :  { %v1424_v5 = vadd.f32 %v1423_v62, %v1393_v8  ;;  %v1171_v43 = vmax.f32 %v1131_v10, 0.0  ;;  %v1650_v11 = vadd.f32 %v1649_v17, %v1648_v52 }
 0x240   :  { %v1651_v29 = vpop.f32.mrf.mxu1 }
 0x241   :  { %v1136_v38 = vadd.f32 %v1650_v11, %v814_v2  ;;  %v1425_v37 = vadd.f32 %v1424_v5, %v1394_v18  ;;  %v1395_v42 = vmul.f32 %v1354_v9, %v1171_v43 }
 0x242   :  { %v1652_v6 = vpop.f32.mrf.mxu1 }
 0x243   :  { %v1172_v49 = vmax.f32 %v1136_v38, 0.0  ;;  %v1653_v15 = vadd.f32 %v1652_v6, %v1651_v29  ;;  %v1426_v50 = vadd.f32 %v1425_v37, %v1395_v42 }
 0x245   :  { %v1396_v39 = vmul.f32 %v1359_v30, %v1172_v49  ;;  %v1139_v22 = vadd.f32 %v1653_v15, %v819_v20 }
 0x247   :  { %v1173_v27 = vmax.f32 %v1139_v22, 0.0  ;;  %v1427_v28 = vadd.f32 %v1426_v50, %v1396_v39 }
 0x249   :  { %v1397_v46 = vmul.f32 %v1364_v1, %v1173_v27 }
 0x24b   :  { %v1428_v33 = vadd.f32 %v1427_v28, %v1397_v46 }
 0x24d   :  { %v1429_v7 = vrot.slane %v1428_v33, 4 }
 0x24f   :  { %v1430_v19 = vadd.f32 %v1429_v7, %v1428_v33 }
 0x251   :  { %v1431_v51 = vrot.slane %v1430_v19, 2 }
 0x253   :  { %v1432_v61 = vadd.f32 %v1431_v51, %v1430_v19 }
 0x255   :  { %v1433_v35 = vrot.slane %v1432_v61, 1 }
 0x257   :  { %v1434_v56 = vadd.f32 %v1433_v35, %v1432_v61 }
 0x259   :  { %v1445_v41 = vadd.f32 %v1444_v54, %v1434_v56 }
 0x25b   :  { %1446 = vst [vmem:[#allocation3] sm:$0x1] %v1445_v41 }
 0x25c   :  { %1784 = shalt.err (!%p1781_p4)
}
 0x25d   :  { %1456 = dma.vmem_to_hbm [thread:$0]  %s1454_s21, 16, %s2587_s7, [#allocation4]  }
 0x25e   :  { %1793 = dma.done.wait [#allocation4], 16  }
 0x25f   :  { %1794 = vsyncadd [#allocation4], 4294967280 }
 0x260   :  { %1460 = vsyncpa [#allocation4], 1 }

</bundles_post_ra>
